<compile_context>
chip_gen: v5e
topology: v5e:2x2
jax: 0.10.0
libtpu: 0.0.40
codegen_flags: <defaults>
</compile_context>

<pallas_src>
import functools

import jax
import jax.numpy as jnp
from jax import lax
from jax.experimental import pallas as pl
from jax.experimental.pallas import tpu as pltpu


def _round_up(a, b):
    return ((a + b - 1) // b) * b


def _vmem_physical_bytes():
    """Physical VMEM per TensorCore; conservative 64 MiB (v7x) fallback."""
    try:
        info = pltpu.get_tpu_info()
        cap = getattr(info, "vmem_capacity_bytes", None)
        if cap:
            return int(cap)
    except Exception:
        pass
    return 64 * 1024 * 1024


def ffn_kernel(x_ref, w1_ref, w2_ref, g_ref, b_ref, o_ref, acc_ref, *scratch,
               eps, cast_x):
    # x_ref: (tm, in_dim)   w1_ref: (in_dim, tk)   w2_ref: (tk, in_dim)
    # g_ref/b_ref: (1, in_dim)   o_ref: (tm, in_dim)   acc_ref: (tm, in_dim) f32
    # scratch[0] (only if cast_x): (tm, in_dim) in the weights' dtype.
    xc_ref = scratch[0] if cast_x else None
    k = pl.program_id(1)

    @pl.when(k == 0)
    def _init():
        acc_ref[...] = jnp.zeros_like(acc_ref)
        if cast_x:
            # Hoisted cast: done once per row tile, reused on every k step.
            xc_ref[...] = x_ref[...].astype(xc_ref.dtype)

    xa = xc_ref[...] if cast_x else x_ref[...]
    w1 = w1_ref[...]
    w2 = w2_ref[...]

    # MXU fed in the weights' storage dtype; f32 accumulation via
    # preferred_element_type.
    h = jnp.dot(xa, w1, preferred_element_type=jnp.float32)
    h = jnp.maximum(h, 0.0)                       # ReLU (elementwise, safe per k-slab)
    ha = h.astype(w2.dtype) if h.dtype != w2.dtype else h
    acc_ref[...] += jnp.dot(ha, w2, preferred_element_type=jnp.float32)

    @pl.when(k == pl.num_programs(1) - 1)
    def _epilogue():
        # Residual add + LayerNorm over the last dim (biased variance), all in f32.
        z = acc_ref[...] + x_ref[...].astype(jnp.float32)
        mean = jnp.mean(z, axis=-1, keepdims=True)
        zc = z - mean
        var = jnp.mean(zc * zc, axis=-1, keepdims=True)
        zn = zc * lax.rsqrt(var + eps)
        out = zn * g_ref[...].astype(jnp.float32) + b_ref[...].astype(jnp.float32)
        o_ref[...] = out.astype(o_ref.dtype)


def poswise_ffn(x, w1, w2, gamma, beta, *, eps=1e-5):
    """x: (B, S, in_dim); w1: (in_dim, feat_dim); w2: (feat_dim, in_dim);
    gamma/beta: (in_dim,). Returns (B, S, in_dim).

    Weights may be bf16; they are fed to the MXU in their storage dtype (this is an
    intentional precision choice -- loosen tolerances vs an all-f32 reference)."""
    B, S, in_dim = x.shape
    feat_dim = w1.shape[1]
    M = B * S

    x_isz = x.dtype.itemsize
    w_isz = w1.dtype.itemsize
    o_isz = x_isz
    cast_x = x.dtype != w1.dtype

    # ---- Per-generation scoped-VMEM budget --------------------------------------
    phys = _vmem_physical_bytes()
    if phys <= 64 * 1024 * 1024:
        # v7x: 64 MiB physical per TC; keep headroom for compiler-internal scratch.
        budget = phys - 12 * 1024 * 1024
    else:
        # v5e / v6e: 128 MiB physical; ~100 MiB scoped is safe.
        budget = min(phys - 28 * 1024 * 1024, 100 * 1024 * 1024)

    def footprint(tm, tk):
        f = 2 * tm * in_dim * x_isz               # x tiles (double buffered)
        f += 2 * tm * in_dim * o_isz              # out tiles (double buffered)
        if cast_x:
            f += tm * in_dim * w_isz              # hoisted x-cast scratch
        f += 2 * in_dim * tk * w_isz              # W1 slab (double buffered)
        f += 2 * tk * in_dim * w_isz              # W2 slab (double buffered)
        f += tm * in_dim * 4                      # f32 accumulator
        f += tm * tk * 4                          # h intermediate (f32 MXU result)
        if w_isz != 4:
            f += tm * tk * w_isz                  # low-precision cast copy of h
        f += 4 * in_dim * 4                       # gamma/beta
        return f

    # ---- Tile selection ----------------------------------------------------------
    # Sublane packing of the row (second-to-last) dim: 8 (f32) / 16 (bf16) / 32 (8-bit).
    sub = {4: 8, 2: 16, 1: 32}.get(x_isz, 8)
    if M <= 1024:
        tm_list = [_round_up(M, sub)]             # single row tile for small M
    else:
        tm_list = [1024, 768, 512, 256]           # 256-aligned for the 256x256 MXU

    tm_eff = tk_eff = None

    # 1) Weights-resident fast path: tk = feat_dim -> constant W index_maps, so the
    #    weight slabs are DMA'd once for the whole kernel.
    for tm in tm_list:
        if footprint(tm, feat_dim) <= budget:
            tm_eff, tk_eff = tm, feat_dim
            break

    # 2) k-tiled path: largest 128-aligned divisor of feat_dim that fits (no HBM
    #    padding of the weights).
    if tm_eff is None:
        tk_divs = [t for t in (2048, 1024, 512, 256, 128)
                   if t < feat_dim and feat_dim % t == 0]
        for tm in tm_list + [128, 64, 32]:
            for tk in tk_divs:
                if footprint(tm, tk) <= budget:
                    tm_eff, tk_eff = tm, tk
                    break
            if tm_eff is not None:
                break

    # 3) Last resort (very unusual shapes): small tiles + padded feat_dim.  Padding
    #    costs an extra HBM pass over the weights; avoided in the normal paths above.
    if tm_eff is None:
        tm_eff = _round_up(min(M, 64), sub)
        tk_eff = 128

    Mp = _round_up(M, tm_eff)
    Kp = _round_up(feat_dim, tk_eff)

    x2 = x.reshape(M, in_dim)
    if Mp != M:
        x2 = jnp.pad(x2, ((0, Mp - M), (0, 0)))
    w1p = w1 if Kp == feat_dim else jnp.pad(w1, ((0, 0), (0, Kp - feat_dim)))
    w2p = w2 if Kp == feat_dim else jnp.pad(w2, ((0, Kp - feat_dim), (0, 0)))
    g2 = gamma.reshape(1, in_dim)
    b2 = beta.reshape(1, in_dim)

    n_rows = Mp // tm_eff
    n_k = Kp // tk_eff
    grid = (n_rows, n_k)

    fp = footprint(tm_eff, tk_eff)
    vmem_limit = int(max(32 * 1024 * 1024, min(budget, int(1.25 * fp))))

    # HBM traffic: weights fetched once when resident (n_k == 1), otherwise
    # re-streamed once per row tile.
    weight_passes = 1 if n_k == 1 else n_rows
    w_bytes = w1p.size * w_isz + w2p.size * w_isz
    bytes_accessed = (Mp * in_dim * x_isz                 # x read
                      + Mp * in_dim * o_isz               # out write
                      + weight_passes * w_bytes           # weight streaming
                      + 2 * in_dim * 4)                   # gamma / beta
    flops = 4 * Mp * in_dim * Kp + 8 * Mp * in_dim
    cost = pl.CostEstimate(flops=flops, transcendentals=Mp,
                           bytes_accessed=bytes_accessed)

    scratch_shapes = [pltpu.VMEM((tm_eff, in_dim), jnp.float32)]
    if cast_x:
        scratch_shapes.append(pltpu.VMEM((tm_eff, in_dim), w1.dtype))

    kernel = functools.partial(ffn_kernel, eps=eps, cast_x=cast_x)

    # NOTE(v7x): if weight-slab DMA is still exposed after raising tm, a third buffer
    # (pipeline_mode=pl.Buffered(3)) on the W1/W2 specs can hide the residual latency.
    out2 = pl.pallas_call(
        kernel,
        out_shape=jax.ShapeDtypeStruct((Mp, in_dim), x.dtype),
        grid_spec=pltpu.PrefetchScalarGridSpec(
            num_scalar_prefetch=0,
            grid=grid,
            in_specs=[
                pl.BlockSpec((tm_eff, in_dim), lambda i, k: (i, 0)),   # x rows
                pl.BlockSpec((in_dim, tk_eff), lambda i, k: (0, k)),   # W1 slab
                pl.BlockSpec((tk_eff, in_dim), lambda i, k: (k, 0)),   # W2 slab
                pl.BlockSpec((1, in_dim), lambda i, k: (0, 0)),        # gamma
                pl.BlockSpec((1, in_dim), lambda i, k: (0, 0)),        # beta
            ],
            out_specs=pl.BlockSpec((tm_eff, in_dim), lambda i, k: (i, 0)),
            scratch_shapes=scratch_shapes,
        ),
        compiler_params=pltpu.CompilerParams(
            dimension_semantics=("parallel", "arbitrary"),
            vmem_limit_bytes=vmem_limit,
        ),
        cost_estimate=cost,
    )(x2, w1p, w2p, g2, b2)

    if Mp != M:
        out2 = out2[:M]                 # drop padded rows (their LN values are garbage)
    return out2.reshape(B, S, in_dim)


def reference(x, w1, w2, gamma, beta, eps=1e-5):
    x32 = x.astype(jnp.float32)
    h = jnp.maximum(x32 @ w1.astype(jnp.float32), 0.0)
    y = h @ w2.astype(jnp.float32)
    z = y + x32
    mean = jnp.mean(z, axis=-1, keepdims=True)
    var = jnp.mean((z - mean) ** 2, axis=-1, keepdims=True)
    zn = (z - mean) * lax.rsqrt(var + eps)
    return (zn * gamma + beta).astype(x.dtype)


if __name__ == "__main__":
    # Small shapes implied by the module: tokens with in_dim features,
    # hidden feat_dim in the position-wise FFN.
    B, S, in_dim, feat_dim = 2, 8, 32, 64

    key = jax.random.PRNGKey(0)
    kx, k1, k2 = jax.random.split(key, 3)

    x = jax.random.normal(kx, (B, S, in_dim), dtype=jnp.float32)

    # PyTorch Linear weight is (out, in), applied as x @ W.T; we store the
    # already-transposed (in, out) layout.
    w1 = (jax.random.normal(k1, (in_dim, feat_dim), dtype=jnp.float32)
          * (1.0 / jnp.sqrt(in_dim)))
    w2 = (jax.random.normal(k2, (feat_dim, in_dim), dtype=jnp.float32)
          * (1.0 / jnp.sqrt(feat_dim)))
    gamma = jnp.ones((in_dim,), dtype=jnp.float32)   # LayerNorm weight init
    beta = jnp.zeros((in_dim,), dtype=jnp.float32)   # LayerNorm bias init

    out = poswise_ffn(x, w1, w2, gamma, beta)
    out = jax.block_until_ready(out)

    ref = reference(x, w1, w2, gamma, beta)
    assert out.shape == (B, S, in_dim)
    assert jnp.allclose(out, ref, atol=1e-5, rtol=1e-5), "mismatch vs reference"

    print("KERNEL_OK")
</pallas_src>

<mosaic_0001>
module attributes {stable_mosaic.version = 11 : i64} {
  func.func @ffn_kernel(%arg0: i32, %arg1: i32, %arg2: memref<16x32xf32, #tpu.memory_space<vmem>>, %arg3: memref<32x64xf32, #tpu.memory_space<vmem>>, %arg4: memref<64x32xf32, #tpu.memory_space<vmem>>, %arg5: memref<1x32xf32, #tpu.memory_space<vmem>>, %arg6: memref<1x32xf32, #tpu.memory_space<vmem>>, %arg7: memref<16x32xf32, #tpu.memory_space<vmem>>, %arg8: memref<16x32xf32, #tpu.memory_space<vmem>>) attributes {dimension_semantics = [#tpu.dimension_semantics<parallel>, #tpu.dimension_semantics<arbitrary>], iteration_bounds = array<i64: 1, 1>, scalar_prefetch = 0 : i64, scratch_operands = 1 : i64, tpu.core_type = #tpu.core_type<tc>, window_params = [{transform_indices = @transform_0, window_bounds = array<i64: 16, 32>}, {transform_indices = @transform_1, window_bounds = array<i64: 32, 64>}, {transform_indices = @transform_2, window_bounds = array<i64: 64, 32>}, {pipeline_mode = #tpu.pipeline_mode<synchronous>, transform_indices = @transform_3, window_bounds = array<i64: 1, 32>}, {pipeline_mode = #tpu.pipeline_mode<synchronous>, transform_indices = @transform_4, window_bounds = array<i64: 1, 32>}, {transform_indices = @transform_5, window_bounds = array<i64: 16, 32>}]} {
    %c0_i32 = arith.constant 0 : i32
    %0 = arith.cmpi eq, %arg1, %c0_i32 : i32
    %1 = arith.extui %0 : i1 to i32
    %c0_i32_0 = arith.constant 0 : i32
    %2 = arith.cmpi ne, %1, %c0_i32_0 : i32
    scf.if %2 {
      %cst_14 = arith.constant 0.000000e+00 : f32
      %16 = vector.broadcast %cst_14 : f32 to vector<16x32xf32>
      %c0_15 = arith.constant 0 : index
      %c0_16 = arith.constant 0 : index
      %17 = vector.load %arg8[%c0_15, %c0_16] : memref<16x32xf32, #tpu.memory_space<vmem>>, vector<16x32xf32>
      tpu.vector_store %arg8[%c0_15, %c0_16], %16 {strides = array<i32>} : memref<16x32xf32, #tpu.memory_space<vmem>>, vector<16x32xf32>,
    } else {
    }
    %c0 = arith.constant 0 : index
    %c0_1 = arith.constant 0 : index
    %3 = vector.load %arg2[%c0, %c0_1] : memref<16x32xf32, #tpu.memory_space<vmem>>, vector<16x32xf32>
    %c0_2 = arith.constant 0 : index
    %c0_3 = arith.constant 0 : index
    %4 = vector.load %arg3[%c0_2, %c0_3] : memref<32x64xf32, #tpu.memory_space<vmem>>, vector<32x64xf32>
    %c0_4 = arith.constant 0 : index
    %c0_5 = arith.constant 0 : index
    %5 = vector.load %arg4[%c0_4, %c0_5] : memref<64x32xf32, #tpu.memory_space<vmem>>, vector<64x32xf32>
    %cst = arith.constant dense<0.000000e+00> : vector<16x64xf32>
    %6 = tpu.matmul %3, %4, %cst {dimension_numbers = #tpu.dot_dimension_numbers<[1], [0], [0], [1], [0, 0, 1, 1], [], []>} : vector<16x32xf32>, vector<32x64xf32>, vector<16x64xf32> -> vector<16x64xf32>
    %cst_6 = arith.constant 0.000000e+00 : f32
    %7 = vector.broadcast %cst_6 : f32 to vector<16x64xf32>
    %8 = arith.maximumf %6, %7 : vector<16x64xf32>
    %c0_7 = arith.constant 0 : index
    %c0_8 = arith.constant 0 : index
    %9 = vector.load %arg8[%c0_7, %c0_8] : memref<16x32xf32, #tpu.memory_space<vmem>>, vector<16x32xf32>
    %cst_9 = arith.constant dense<0.000000e+00> : vector<16x32xf32>
    %10 = tpu.matmul %8, %5, %cst_9 {dimension_numbers = #tpu.dot_dimension_numbers<[1], [0], [0], [1], [0, 0, 1, 1], [], []>} : vector<16x64xf32>, vector<64x32xf32>, vector<16x32xf32> -> vector<16x32xf32>
    %11 = arith.addf %9, %10 : vector<16x32xf32>
    %c0_10 = arith.constant 0 : index
    %c0_11 = arith.constant 0 : index
    %12 = vector.load %arg8[%c0_10, %c0_11] : memref<16x32xf32, #tpu.memory_space<vmem>>, vector<16x32xf32>
    tpu.vector_store %arg8[%c0_10, %c0_11], %11 {strides = array<i32>} : memref<16x32xf32, #tpu.memory_space<vmem>>, vector<16x32xf32>,
    %c0_i32_12 = arith.constant 0 : i32
    %13 = arith.cmpi eq, %arg1, %c0_i32_12 : i32
    %14 = arith.extui %13 : i1 to i32
    %c0_i32_13 = arith.constant 0 : i32
    %15 = arith.cmpi ne, %14, %c0_i32_13 : i32
    scf.if %15 {
      %c0_14 = arith.constant 0 : index
      %c0_15 = arith.constant 0 : index
      %16 = vector.load %arg8[%c0_14, %c0_15] : memref<16x32xf32, #tpu.memory_space<vmem>>, vector<16x32xf32>
      %c0_16 = arith.constant 0 : index
      %c0_17 = arith.constant 0 : index
      %17 = vector.load %arg2[%c0_16, %c0_17] : memref<16x32xf32, #tpu.memory_space<vmem>>, vector<16x32xf32>
      %18 = arith.addf %16, %17 : vector<16x32xf32>
      %cst_18 = arith.constant dense<0.000000e+00> : vector<16xf32>
      %19 = vector.multi_reduction <add>, %18, %cst_18 [1] : vector<16x32xf32> to vector<16xf32>
      %20 = vector.shape_cast %19 : vector<16xf32> to vector<16x1xf32>
      %cst_19 = arith.constant 3.200000e+01 : f32
      %21 = vector.broadcast %cst_19 : f32 to vector<16x1xf32>
      %22 = arith.divf %20, %21 : vector<16x1xf32>
      %23 = vector.broadcast %22 : vector<16x1xf32> to vector<16x32xf32>
      %24 = arith.subf %18, %23 : vector<16x32xf32>
      %25 = arith.mulf %24, %24 : vector<16x32xf32>
      %cst_20 = arith.constant dense<0.000000e+00> : vector<16xf32>
      %26 = vector.multi_reduction <add>, %25, %cst_20 [1] : vector<16x32xf32> to vector<16xf32>
      %27 = vector.shape_cast %26 : vector<16xf32> to vector<16x1xf32>
      %cst_21 = arith.constant 3.200000e+01 : f32
      %28 = vector.broadcast %cst_21 : f32 to vector<16x1xf32>
      %29 = arith.divf %27, %28 : vector<16x1xf32>
      %cst_22 = arith.constant 9.99999974E-6 : f32
      %30 = vector.broadcast %cst_22 : f32 to vector<16x1xf32>
      %31 = arith.addf %29, %30 : vector<16x1xf32>
      %32 = math.rsqrt %31 : vector<16x1xf32>
      %33 = vector.broadcast %32 : vector<16x1xf32> to vector<16x32xf32>
      %34 = arith.mulf %24, %33 : vector<16x32xf32>
      %c0_23 = arith.constant 0 : index
      %c0_24 = arith.constant 0 : index
      %35 = vector.load %arg5[%c0_23, %c0_24] : memref<1x32xf32, #tpu.memory_space<vmem>>, vector<1x32xf32>
      %36 = vector.broadcast %35 : vector<1x32xf32> to vector<16x32xf32>
      %37 = arith.mulf %34, %36 : vector<16x32xf32>
      %c0_25 = arith.constant 0 : index
      %c0_26 = arith.constant 0 : index
      %38 = vector.load %arg6[%c0_25, %c0_26] : memref<1x32xf32, #tpu.memory_space<vmem>>, vector<1x32xf32>
      %39 = vector.broadcast %38 : vector<1x32xf32> to vector<16x32xf32>
      %40 = arith.addf %37, %39 : vector<16x32xf32>
      %c0_27 = arith.constant 0 : index
      %c0_28 = arith.constant 0 : index
      %41 = vector.load %arg7[%c0_27, %c0_28] : memref<16x32xf32, #tpu.memory_space<vmem>>, vector<16x32xf32>
      tpu.vector_store %arg7[%c0_27, %c0_28], %40 {strides = array<i32>} : memref<16x32xf32, #tpu.memory_space<vmem>>, vector<16x32xf32>,
    } else {
    }
    return
  }
  func.func @transform_0(%arg0: i32, %arg1: i32) -> (i32, i32) {
    %c0_i32 = arith.constant 0 : i32
    %c0_i32_0 = arith.constant 0 : i32
    return %arg0, %c0_i32 : i32, i32
  }
  func.func @transform_1(%arg0: i32, %arg1: i32) -> (i32, i32) {
    %c0_i32 = arith.constant 0 : i32
    %c0_i32_0 = arith.constant 0 : i32
    return %c0_i32, %arg1 : i32, i32
  }
  func.func @transform_2(%arg0: i32, %arg1: i32) -> (i32, i32) {
    %c0_i32 = arith.constant 0 : i32
    %c0_i32_0 = arith.constant 0 : i32
    return %arg1, %c0_i32 : i32, i32
  }
  func.func @transform_3(%arg0: i32, %arg1: i32) -> (i32, i32) {
    %c0_i32 = arith.constant 0 : i32
    %c0_i32_0 = arith.constant 0 : i32
    %c0_i32_1 = arith.constant 0 : i32
    return %c0_i32, %c0_i32_0 : i32, i32
  }
  func.func @transform_4(%arg0: i32, %arg1: i32) -> (i32, i32) {
    %c0_i32 = arith.constant 0 : i32
    %c0_i32_0 = arith.constant 0 : i32
    %c0_i32_1 = arith.constant 0 : i32
    return %c0_i32, %c0_i32_0 : i32, i32
  }
  func.func @transform_5(%arg0: i32, %arg1: i32) -> (i32, i32) {
    %c0_i32 = arith.constant 0 : i32
    %c0_i32_0 = arith.constant 0 : i32
    return %arg0, %c0_i32 : i32, i32
  }
}

</mosaic_0001>

<bundles_post_ra>
// kernel: tpu_custom_call.1
= control target key start
LH: loop header
LB: loop body
LE: loop exit
PB: predicated region body
PF: predicated region fallthrough
CT: control target
= control target key end

     0   :  { %s355_s0 = inlined_call_operand.vmem [shape: f32[16,32], index: 0, kind: input, shape index: {}]   ;;  %s356_s1 = inlined_call_operand.vmem [shape: f32[32,64], index: 1, kind: input, shape index: {}]   ;;  %s357_s2 = inlined_call_operand.vmem [shape: f32[64,32], index: 2, kind: input, shape index: {}]   ;;  %s358_s3 = inlined_call_operand.vmem [shape: f32[1,32], index: 3, kind: input, shape index: {}]   ;;  %s359_s4 = inlined_call_operand.vmem [shape: f32[1,32], index: 4, kind: input, shape index: {}]   ;;  %s360_s5 = inlined_call_operand.hbm [shape: f32[16,32], index: 5, kind: output, shape index: {}]  }
   0x1   :  { %v33_v0 = vld [vmem:[%s356_s1 + $0x18] sm:$0xff]  ;;  %v32_v1 = vld [vmem:[%s356_s1 + $0x10] sm:$0xff]  ;;  %v31_v2 = vld [vmem:[%s356_s1 + $0x8] sm:$0xff] }
   0x2   :  { %61 = vmatpush.msra.mxu0 %v33_v0  ;;  %206 = vmatpush.msra.mxu3 %v33_v0  ;;  %v41_v3 = vld [vmem:[%s357_s2 + $0x38] sm:$0xff]  ;;  %v30_v4 = vld [vmem:[%s356_s1] sm:$0xff]  ;;  %v40_v5 = vld [vmem:[%s357_s2 + $0x30] sm:$0xff] }
   0x3   :  { %91 = vmatpush.msra.mxu1 %v41_v3  ;;  %210 = vmatpush.msra.mxu2 %v41_v3 }
   0x4   :  { %62 = vmatpush.msra.mxu0 %v32_v1  ;;  %207 = vmatpush.msra.mxu3 %v32_v1 }
   0x5   :  { %10 = vsyncpa [#allocation4], 0  ;;  %vm25_vm0 = vcmask 261120   ;;  %v28_v6 = vld [vmem:[%s355_s0] sm:$0xff]  ;;  %v29_v7 = vld [vmem:[%s355_s0 + $0x8] sm:$0xff]  ;;  %92 = vmatpush.msra.mxu1 %v40_v5  ;;  %211 = vmatpush.msra.mxu2 %v40_v5  ;;  %v257_v14 = vmov 0.0  }
   0x6   :  { %63 = vmatpush.msra.mxu0 %v31_v2  ;;  %208 = vmatpush.msra.mxu3 %v31_v2  ;;  %v39_v8 = vld [vmem:[%s357_s2 + $0x28] sm:$0xff]  ;;  %v38_v9 = vld [vmem:[%s357_s2 + $0x20] sm:$0xff]  ;;  %v37_v10 = vld [vmem:[%s357_s2 + $0x18] sm:$0xff]  ;;  %26 = vst.msk [vmem:[#allocation2] sm:$0xff] %vm25_vm0, %v257_v14  ;;  %vm76_vm1 = vcmask 523264   ;;  %v258_v31 = vmov 32.0  }
   0x7   :  { %93 = vmatpush.msra.mxu1 %v39_v8  ;;  %212 = vmatpush.msra.mxu2 %v39_v8  ;;  %v36_v11 = vld [vmem:[%s357_s2 + $0x10] sm:$0xff]  ;;  %v35_v12 = vld [vmem:[%s357_s2 + $0x8] sm:$0xff]  ;;  %v34_v13 = vld [vmem:[%s357_s2] sm:$0xff]  ;;  %27 = vst.msk [vmem:[#allocation2 + $0x8] sm:$0xff] %vm25_vm0, %v257_v14  ;;  %225 = vrcp.f32 %v258_v31  ;;  %s260_s25 = smov 128   ;;  %s261_s26 = smov 8  }
   0x8   :  { %64 = vmatpush.msra.mxu0 %v30_v4  ;;  %209 = vmatpush.msra.mxu3 %v30_v4  ;;  %v223_v60 = vld [vmem:[%s358_s3] ss:$0 sm:$0xff]  ;;  %s259_s3 = smov [#allocation3]  }
   0x9   :  { %202 = vmatmul.msk.f32.vlgmr.msra.gmra.mxu0 %vm25_vm0, %v28_v6  ;;  %203 = vmatmul.msk.f32.vlgmr.msra.gmra.mxu3 %vm25_vm0, %v29_v7  ;;  %v224_v0 = vld [vmem:[%s359_s4] ss:$0 sm:$0xff]  ;;  %s188_s22 = sshll.u32 %s259_s3, 4  ;;  %s190_s4 = sshll.u32 %s360_s5, 4  ;;  %s189_s22 = int_to_ptr.vmem [resolvable:$true] %s188_s22  ;;  %s191_s4 = int_to_ptr.hbm [resolvable:$true] %s190_s4 }
   0xa   :  { %94 = vmatpush.msra.mxu1 %v38_v9  ;;  %213 = vmatpush.msra.mxu2 %v38_v9 }
   0xc   :  { %95 = vmatpush.msra.mxu1 %v37_v10  ;;  %214 = vmatpush.msra.mxu2 %v37_v10 }
   0xd   :  { %v74_v19 = vld [vmem:[#allocation2] sm:$0xff]  ;;  %v226_v32 = vpop.eup %225 }
   0xe   :  { %96 = vmatpush.msra.mxu1 %v36_v11  ;;  %215 = vmatpush.msra.mxu2 %v36_v11  ;;  %v75_v22 = vld [vmem:[#allocation2 + $0x8] sm:$0xff]  ;;  %v126_v33 = vmul.f32 32.0, %v226_v32  ;;  %vm130_vm2 = vweird.f32 %v226_v32 }
  0x10   :  { %97 = vmatpush.msra.mxu1 %v35_v12  ;;  %216 = vmatpush.msra.mxu2 %v35_v12  ;;  %v127_v34 = vsub.f32 1.0, %v126_v33 }
  0x12   :  { %98 = vmatpush.msra.mxu1 %v34_v13  ;;  %217 = vmatpush.msra.mxu2 %v34_v13  ;;  %v128_v35 = vmul.f32 %v226_v32, %v127_v34 }
  0x14   :  { %v129_v36 = vadd.f32 %v226_v32, %v128_v35 }
  0x16   :  { %v131_v37 = vsel %vm130_vm2, %v226_v32, %v129_v36 }
  0x86   :  { %v66_v15 = vpop.f32.mrf.mxu0 }
  0x87   :  { %v72_v16 = vmax.f32 %v66_v15, 0.0 }
  0x89   :  { %204 = vmatmul.msk.f32.vlgmr.msra.gmra.mxu1 %vm76_vm1, %v72_v16 }
  0x8c   :  { %v69_v17 = vpop.f32.mrf.mxu3 }
  0x8d   :  { %v73_v18 = vmax.f32 %v69_v17, 0.0 }
  0x8f   :  { %205 = vmatmul.msk.f32.vlgmr.msra.gmra.mxu2 %vm76_vm1, %v73_v18 }
 0x106   :  { %v100_v20 = vpop.f32.mrf.mxu1 }
 0x107   :  { %v106_v21 = vadd.f32 %v100_v20, %v74_v19 }
 0x109   :  { %108 = vst.msk [vmem:[#allocation2] sm:$0xff] %vm25_vm0, %v106_v21 }
 0x110   :  { %v113_v23 = vld [vmem:[#allocation2] sm:$0xff] }
 0x111   :  { %v117_v24 = vadd.f32 %v113_v23, %v28_v6 }
 0x112   :  { %v103_v25 = vpop.f32.mrf.mxu2 }
 0x113   :  { %v107_v26 = vadd.f32 %v103_v25, %v75_v22  ;;  %v119_v27 = vsel %vm25_vm0, %v117_v24, 0.0 }
 0x114   :  { %120 = vadd.xlane.f32.xlu0 %v119_v27 }
 0x115   :  { %109 = vst.msk [vmem:[#allocation2 + $0x8] sm:$0xff] %vm25_vm0, %v107_v26 }
 0x11c   :  { %v114_v28 = vld [vmem:[#allocation2 + $0x8] sm:$0xff] }
 0x11d   :  { %v118_v29 = vadd.f32 %v114_v28, %v29_v7 }
 0x11f   :  { %v122_v30 = vsel %vm25_vm0, %v118_v29, 0.0 }
 0x120   :  { %123 = vadd.xlane.f32.xlu0 %v122_v30 }
 0x187   :  { %v121_v38 = vpop.xlane.xlu0 %120 }
 0x188   :  { %v132_v39 = vmul.f32 %v131_v37, %v121_v38 }
 0x18a   :  { %v134_v40 = vsub.f32 %v117_v24, %v132_v39 }
 0x18c   :  { %v136_v41 = vmul.f32 %v134_v40, %v134_v40 }
 0x18e   :  { %v138_v42 = vsel %vm25_vm0, %v136_v41, 0.0 }
 0x18f   :  { %139 = vadd.xlane.f32.xlu1 %v138_v42 }
 0x193   :  { %v124_v43 = vpop.xlane.xlu0 %123 }
 0x194   :  { %v133_v44 = vmul.f32 %v131_v37, %v124_v43 }
 0x196   :  { %v135_v45 = vsub.f32 %v118_v29, %v133_v44 }
 0x198   :  { %v137_v46 = vmul.f32 %v135_v45, %v135_v45 }
 0x19a   :  { %v141_v47 = vsel %vm25_vm0, %v137_v46, 0.0 }
 0x19b   :  { %142 = vadd.xlane.f32.xlu1 %v141_v47 }
 0x202   :  { %v140_v48 = vpop.xlane.xlu1 %139 }
 0x203   :  { %v144_v49 = vmul.f32 %v140_v48, %v131_v37 }
 0x205   :  { %v146_v50 = vadd.f32 1e-05, %v144_v49 }
 0x207   :  { %227 = vrsqrt.f32 %v146_v50  ;;  %vm154_vm4 = vweird.f32 %v146_v50 }
 0x20d   :  { %v228_v51 = vpop.eup %227 }
 0x20e   :  { %v149_v52 = vmul.f32 %v228_v51, %v146_v50  ;;  %v143_v53 = vpop.xlane.xlu1 %142  ;;  %vm155_vm3 = vweird.f32 %v228_v51 }
 0x20f   :  { %v145_v54 = vmul.f32 %v143_v53, %v131_v37  ;;  %vm156_vm5 = vmor %vm154_vm4, %vm155_vm3 }
 0x210   :  { %v150_v55 = vmul.f32 %v228_v51, %v149_v52 }
 0x211   :  { %v147_v56 = vadd.f32 1e-05, %v145_v54 }
 0x212   :  { %v151_v57 = vmul.f32 0.5, %v150_v55 }
 0x213   :  { %229 = vrsqrt.f32 %v147_v56  ;;  %vm164_vm7 = vweird.f32 %v147_v56 }
 0x214   :  { %v152_v58 = vsub.f32 1.5, %v151_v57 }
 0x216   :  { %v153_v59 = vmul.f32 %v228_v51, %v152_v58 }
 0x218   :  { %v157_v61 = vsel %vm156_vm5, %v228_v51, %v153_v59 }
 0x219   :  { %v230_v62 = vpop.eup %229  ;;  %v168_v63 = vmul.f32 %v157_v61, %v134_v40 }
 0x21a   :  { %v159_v1 = vmul.f32 %v230_v62, %v147_v56  ;;  %vm165_vm6 = vweird.f32 %v230_v62 }
 0x21b   :  { %v174_v2 = vmul.f32 %v223_v60, %v168_v63  ;;  %vm166_vm8 = vmor %vm164_vm7, %vm165_vm6 }
 0x21c   :  { %v160_v3 = vmul.f32 %v230_v62, %v159_v1 }
 0x21d   :  { %v180_v4 = vadd.f32 %v224_v0, %v174_v2 }
 0x21e   :  { %v161_v5 = vmul.f32 0.5, %v160_v3 }
 0x21f   :  { %182 = vst.msk [vmem:[#allocation3] sm:$0xff] %vm25_vm0, %v180_v4 }
 0x220   :  { %v162_v6 = vsub.f32 1.5, %v161_v5 }
 0x222   :  { %v163_v7 = vmul.f32 %v230_v62, %v162_v6 }
 0x224   :  { %v167_v8 = vsel %vm166_vm8, %v230_v62, %v163_v7 }
 0x225   :  { %v169_v9 = vmul.f32 %v167_v8, %v135_v45 }
 0x227   :  { %v175_v10 = vmul.f32 %v223_v60, %v169_v9 }
 0x229   :  { %v181_v11 = vadd.f32 %v224_v0, %v175_v10 }
 0x22b   :  { %183 = vst.msk [vmem:[#allocation3 + $0x8] sm:$0xff] %vm25_vm0, %v181_v11 }
 0x22c   :  { %196 = dma.vmem_to_hbm [thread:$0]  %s189_s22, 256, %s191_s4, [#allocation4], %s260_s25, %s260_s25, %s261_s26  }
 0x22d   :  { %255 = dma.done.wait [#allocation4], 256  }
 0x22e   :  { %256 = vsyncadd [#allocation4], 4294967040 }
 0x22f   :  { %201 = vsyncpa [#allocation4], 1 }

</bundles_post_ra>
